<compile_context>
chip_gen: v7x
topology: tpu7x:2x2x1
jax: 0.10.0
libtpu: 0.0.40
codegen_flags: <defaults>
</compile_context>

<pallas_src>
import functools

import jax
import jax.numpy as jnp
from jax.experimental import pallas as pl
from jax.experimental.pallas import tpu as pltpu

HIDDEN = 256   # fc1 output width (fixed by the module)
TILE_B = 256   # batch rows per grid step (multiple of 128; >=256 for v6e/v7x MXU)


def _critic_kernel(xt_ref, w1_ref, b1_ref, wv_ref, bv_ref, out_ref):
    # xt : (D, TILE_B)  bf16  -- transposed input tile (batch along lanes)
    # w1 : (256, D)     bf16  -- fc1 weight, PyTorch (out, in) layout
    # b1 : (256, 1)     f32   -- fc1 bias as a column
    # wv : (256, 1)     f32   -- value-head weight as a column
    # bv : (1, 1)       f32   -- value-head bias, in SMEM
    # out: (1, TILE_B)  f32   -- one value per batch row, lane-dense
    h = jnp.dot(w1_ref[...], xt_ref[...], preferred_element_type=jnp.float32)
    h = jnp.maximum(h + b1_ref[...], 0.0)            # bias + ReLU in f32 (VPU)
    p = h * wv_ref[...]                              # value-head weighting (VPU)
    v = jnp.sum(p, axis=0, keepdims=True)            # sublane reduce -> (1, TILE_B)
    out_ref[...] = v + bv_ref[0, 0]


@functools.partial(jax.jit, static_argnames=("tile_b",))
def critic_forward(x, w1, b1, wv, bv, *, tile_b=TILE_B):
    """x:(B,D) f32; w1:(256,D); b1:(256,); wv:(1,256); bv:(1,) -> (B,1) f32."""
    B, D = x.shape
    n_tiles = max(1, -(-B // tile_b))
    b_pad = n_tiles * tile_b

    # Lane-dense bf16 activations / weights (f32 accumulation on the MXU).
    xt = jnp.pad(x.T.astype(jnp.bfloat16), ((0, 0), (0, b_pad - B)))   # (D, b_pad)
    w1_bf = w1.astype(jnp.bfloat16)                                    # (256, D)
    b1_col = b1.reshape(HIDDEN, 1).astype(jnp.float32)
    wv_col = wv.reshape(HIDDEN, 1).astype(jnp.float32)
    bv_sc = bv.reshape(1, 1).astype(jnp.float32)

    out = pl.pallas_call(
        _critic_kernel,
        out_shape=jax.ShapeDtypeStruct((1, b_pad), jnp.float32),
        grid=(n_tiles,),
        in_specs=[
            pl.BlockSpec((D, tile_b), lambda i: (0, i)),           # x tile
            pl.BlockSpec((HIDDEN, D), lambda i: (0, 0)),           # w1 (pinned)
            pl.BlockSpec((HIDDEN, 1), lambda i: (0, 0)),           # b1 (pinned)
            pl.BlockSpec((HIDDEN, 1), lambda i: (0, 0)),           # wv (pinned)
            pl.BlockSpec(memory_space=pltpu.MemorySpace.SMEM),     # bv scalar
        ],
        out_specs=pl.BlockSpec((1, tile_b), lambda i: (0, i)),
        compiler_params=pltpu.CompilerParams(
            dimension_semantics=("parallel",),    # batch tiles across TCs (v7x)
        ),
    )(xt, w1_bf, b1_col, wv_col, bv_sc)

    return out[0, :B].reshape(B, 1)


def init_critic_params(key, state_dim):
    """PyTorch-style nn.Linear init (U[-1/sqrt(fan_in), +1/sqrt(fan_in)]), (out, in) layout."""
    k1, k2, k3, k4 = jax.random.split(key, 4)
    bound1 = 1.0 / jnp.sqrt(jnp.float32(state_dim))
    w1 = jax.random.uniform(k1, (HIDDEN, state_dim), jnp.float32, -bound1, bound1)
    b1 = jax.random.uniform(k2, (HIDDEN,), jnp.float32, -bound1, bound1)
    boundv = 1.0 / jnp.sqrt(jnp.float32(HIDDEN))
    wv = jax.random.uniform(k3, (1, HIDDEN), jnp.float32, -boundv, boundv)
    bv = jax.random.uniform(k4, (1,), jnp.float32, -boundv, boundv)
    return w1, b1, wv, bv
    # TODO(synk): fc2 = nn.Linear(128, 128) exists in the module but is never
    # used in forward(), so it is intentionally not implemented.


def critic_ref(x, w1, b1, wv, bv):
    # Reference uses the same bf16-rounded matmul operands as the kernel.
    xq = x.astype(jnp.bfloat16).astype(jnp.float32)
    w1q = w1.astype(jnp.bfloat16).astype(jnp.float32)
    h = jnp.maximum(
        jnp.dot(xq, w1q.T, precision=jax.lax.Precision.HIGHEST) + b1, 0.0)
    return jnp.sum(h * wv, axis=-1, keepdims=True) + bv.reshape(1, 1)


if __name__ == "__main__":
    key = jax.random.PRNGKey(0)
    kx, kp = jax.random.split(key)

    batch = 8
    state_dim = 32  # small RL state dimension

    x = jax.random.normal(kx, (batch, state_dim), jnp.float32)
    w1, b1, wv, bv = init_critic_params(kp, state_dim)

    out = critic_forward(x, w1, b1, wv, bv)
    out = jax.block_until_ready(out)

    ref = critic_ref(x, w1, b1, wv, bv)
    assert out.shape == (batch, 1), out.shape
    assert jnp.allclose(out, ref, atol=1e-3, rtol=1e-3), (out, ref)

    print("KERNEL_OK")
</pallas_src>

<mosaic_0001>
module attributes {stable_mosaic.version = 11 : i64} {
  func.func @_critic_kernel(%arg0: i32, %arg1: memref<32x256xbf16, #tpu.memory_space<vmem>>, %arg2: memref<256x32xbf16, #tpu.memory_space<vmem>>, %arg3: memref<256x1xf32, #tpu.memory_space<vmem>>, %arg4: memref<256x1xf32, #tpu.memory_space<vmem>>, %arg5: memref<1x1xf32, #tpu.memory_space<smem>>, %arg6: memref<1x256xf32, #tpu.memory_space<vmem>>) attributes {dimension_semantics = [#tpu.dimension_semantics<parallel>], iteration_bounds = array<i64: 1>, scalar_prefetch = 0 : i64, scratch_operands = 0 : i64, tpu.core_type = #tpu.core_type<tc>, window_params = [{transform_indices = @transform_0, window_bounds = array<i64: 32, 256>}, {pipeline_mode = #tpu.pipeline_mode<synchronous>, transform_indices = @transform_1, window_bounds = array<i64: 256, 32>}, {pipeline_mode = #tpu.pipeline_mode<synchronous>, transform_indices = @transform_2, window_bounds = array<i64: 256, 1>}, {pipeline_mode = #tpu.pipeline_mode<synchronous>, transform_indices = @transform_3, window_bounds = array<i64: 256, 1>}, {transform_indices = @transform_4, window_bounds = array<i64: 1, 1>}, {transform_indices = @transform_5, window_bounds = array<i64: 1, 256>}]} {
    %c0 = arith.constant 0 : index
    %c0_0 = arith.constant 0 : index
    %0 = vector.load %arg2[%c0, %c0_0] : memref<256x32xbf16, #tpu.memory_space<vmem>>, vector<256x32xbf16>
    %c0_1 = arith.constant 0 : index
    %c0_2 = arith.constant 0 : index
    %1 = vector.load %arg1[%c0_1, %c0_2] : memref<32x256xbf16, #tpu.memory_space<vmem>>, vector<32x256xbf16>
    %cst = arith.constant dense<0.000000e+00> : vector<256x256xf32>
    %2 = tpu.matmul %0, %1, %cst {dimension_numbers = #tpu.dot_dimension_numbers<[1], [0], [0], [1], [0, 0, 1, 1], [], []>} : vector<256x32xbf16>, vector<32x256xbf16>, vector<256x256xf32> -> vector<256x256xf32>
    %c0_3 = arith.constant 0 : index
    %c0_4 = arith.constant 0 : index
    %3 = vector.load %arg3[%c0_3, %c0_4] : memref<256x1xf32, #tpu.memory_space<vmem>>, vector<256x1xf32>
    %4 = vector.broadcast %3 : vector<256x1xf32> to vector<256x256xf32>
    %5 = arith.addf %2, %4 : vector<256x256xf32>
    %cst_5 = arith.constant 0.000000e+00 : f32
    %6 = vector.broadcast %cst_5 : f32 to vector<256x256xf32>
    %7 = arith.maximumf %5, %6 : vector<256x256xf32>
    %c0_6 = arith.constant 0 : index
    %c0_7 = arith.constant 0 : index
    %8 = vector.load %arg4[%c0_6, %c0_7] : memref<256x1xf32, #tpu.memory_space<vmem>>, vector<256x1xf32>
    %9 = vector.broadcast %8 : vector<256x1xf32> to vector<256x256xf32>
    %10 = arith.mulf %7, %9 : vector<256x256xf32>
    %cst_8 = arith.constant dense<0.000000e+00> : vector<256xf32>
    %11 = vector.multi_reduction <add>, %10, %cst_8 [0] : vector<256x256xf32> to vector<256xf32>
    %12 = vector.shape_cast %11 : vector<256xf32> to vector<1x256xf32>
    %c0_9 = arith.constant 0 : index
    %c0_10 = arith.constant 0 : index
    %13 = memref.load %arg5[%c0_9, %c0_10] : memref<1x1xf32, #tpu.memory_space<smem>>
    %14 = vector.broadcast %13 : f32 to vector<1x256xf32>
    %15 = arith.addf %12, %14 : vector<1x256xf32>
    %c0_11 = arith.constant 0 : index
    %c0_12 = arith.constant 0 : index
    %16 = vector.load %arg6[%c0_11, %c0_12] : memref<1x256xf32, #tpu.memory_space<vmem>>, vector<1x256xf32>
    tpu.vector_store %arg6[%c0_11, %c0_12], %15 {strides = array<i32>} : memref<1x256xf32, #tpu.memory_space<vmem>>, vector<1x256xf32>,
    return
  }
  func.func @transform_0(%arg0: i32) -> (i32, i32) {
    %c0_i32 = arith.constant 0 : i32
    %c0_i32_0 = arith.constant 0 : i32
    return %c0_i32, %arg0 : i32, i32
  }
  func.func @transform_1(%arg0: i32) -> (i32, i32) {
    %c0_i32 = arith.constant 0 : i32
    %c0_i32_0 = arith.constant 0 : i32
    %c0_i32_1 = arith.constant 0 : i32
    return %c0_i32, %c0_i32_0 : i32, i32
  }
  func.func @transform_2(%arg0: i32) -> (i32, i32) {
    %c0_i32 = arith.constant 0 : i32
    %c0_i32_0 = arith.constant 0 : i32
    %c0_i32_1 = arith.constant 0 : i32
    return %c0_i32, %c0_i32_0 : i32, i32
  }
  func.func @transform_3(%arg0: i32) -> (i32, i32) {
    %c0_i32 = arith.constant 0 : i32
    %c0_i32_0 = arith.constant 0 : i32
    %c0_i32_1 = arith.constant 0 : i32
    return %c0_i32, %c0_i32_0 : i32, i32
  }
  func.func @transform_4(%arg0: i32) -> (i32, i32) {
    %c0_i32 = arith.constant 0 : i32
    %c0_i32_0 = arith.constant 0 : i32
    %c0_i32_1 = arith.constant 0 : i32
    return %c0_i32, %c0_i32_0 : i32, i32
  }
  func.func @transform_5(%arg0: i32) -> (i32, i32) {
    %c0_i32 = arith.constant 0 : i32
    %c0_i32_0 = arith.constant 0 : i32
    return %c0_i32, %arg0 : i32, i32
  }
}

</mosaic_0001>

<bundles_post_ra>
// kernel: critic_forward.1
= control target key start
LH: loop header
LB: loop body
LE: loop exit
PB: predicated region body
PF: predicated region fallthrough
CT: control target
= control target key end

     0   :  { %v1083_v0 = vmov 0   ;;  %vm350_vm0 = vcmask 261120   ;;  %s1699_s2 = inlined_call_operand.vmem [shape: f32[256,1], index: 2, kind: input, shape index: {}]   ;;  %s1700_s0 = inlined_call_operand.vmem [shape: bf16[32,256], index: 0, kind: input, shape index: {}]   ;;  %s1701_s1 = inlined_call_operand.vmem [shape: bf16[256,32], index: 1, kind: input, shape index: {}]   ;;  %s1702_s3 = inlined_call_operand.vmem [shape: f32[256,1], index: 3, kind: input, shape index: {}]   ;;  %s1703_s4 = inlined_call_operand.<no memory space> [shape: f32[1,1], index: 4, kind: input, shape index: {}]   ;;  %s1704_s5 = inlined_call_operand.vmem [shape: f32[1,256], index: 5, kind: output, shape index: {}]  }
   0x1   :  { %1060 = vset.pattern.permute.xlu1 %v1083_v0  ;;  %1059 = vset.pattern.permute.xlu0 %v1083_v0  ;;  %v60_v1 = vld [vmem:[%s1699_s2 + $0x10] sm:$0xff]  ;;  %v58_v2 = vld [vmem:[%s1699_s2] sm:$0xff]  ;;  %v61_v5 = vld [vmem:[%s1699_s2 + $0x18] sm:$0xff] }
   0x2   :  { %102 = vperm.xlu1 %1060, %v60_v1   ;;  %92 = vperm.xlu0 %1059, %v58_v2   ;;  %v1061_v3 = vld [vmem:[%s1700_s0 + $0x4] ss:$8 sps:$4 sm:$0xff]   ;;  %v1063_v4 = vld [vmem:[%s1700_s0] ss:$8 sps:$4 sm:$0xff]   ;;  %v1064_v7 = vld [vmem:[%s1700_s0 + $0x14] ss:$8 sps:$4 sm:$0xff]  }
   0x3   :  { %v59_v6 = vld [vmem:[%s1699_s2 + $0x8] sm:$0xff]  ;;  %431 = vmatprep.mubr.bf16.mxu0 %v1083_v0  ;;  %511 = vmatprep.mubr.bf16.mxu1 %v1083_v0  ;;  %v1066_v8 = vld [vmem:[%s1700_s0 + $0x10] ss:$8 sps:$4 sm:$0xff]   ;;  %v62_v10 = vld [vmem:[%s1699_s2 + $0x20] sm:$0xff] }
   0x4   :  { %399 = vmatprep.subr.bf16.mxu0 %v1061_v3  ;;  %1053 = vmatprep.subr.bf16.mxu1 %v1061_v3  ;;  %v63_v9 = vld [vmem:[%s1699_s2 + $0x28] sm:$0xff]  ;;  %v1067_v11 = vld [vmem:[%s1701_s1] sm:$0xff]   ;;  %v65_v13 = vld [vmem:[%s1699_s2 + $0x38] sm:$0xff] }
   0x5   :  { %400 = vmatpush1.bf16.msra.mxu0 %v1063_v4  ;;  %1055 = vmatpush1.bf16.msra.mxu1 %v1063_v4  ;;  %v1068_v12 = vld [vmem:[%s1701_s1 + $0x40] sm:$0xff]   ;;  %v64_v14 = vld [vmem:[%s1699_s2 + $0x30] sm:$0xff]  ;;  %v67_v15 = vld [vmem:[%s1699_s2 + $0x48] sm:$0xff] }
   0x6   :  { %107 = vperm.xlu1 %1060, %v61_v5   ;;  %97 = vperm.xlu0 %1059, %v59_v6   ;;  %v66_v16 = vld [vmem:[%s1699_s2 + $0x40] sm:$0xff]  ;;  %v1069_v17 = vld [vmem:[%s1701_s1 + $0x8] sm:$0xff]   ;;  %v69_v19 = vld [vmem:[%s1699_s2 + $0x58] sm:$0xff] }
   0x7   :  { %401 = vmatprep.subr.bf16.mxu0 %v1064_v7  ;;  %1054 = vmatprep.subr.bf16.mxu1 %v1064_v7  ;;  %v1070_v18 = vld [vmem:[%s1701_s1 + $0x48] sm:$0xff]   ;;  %v68_v20 = vld [vmem:[%s1699_s2 + $0x50] sm:$0xff]  ;;  %v70_v22 = vld [vmem:[%s1699_s2 + $0x60] sm:$0xff] }
   0x8   :  { %v71_v21 = vld [vmem:[%s1699_s2 + $0x68] sm:$0xff]  ;;  %v1071_v23 = vld [vmem:[%s1701_s1 + $0x10] sm:$0xff]   ;;  %v73_v25 = vld [vmem:[%s1699_s2 + $0x78] sm:$0xff] }
   0x9   :  { %402 = vmatpush1.bf16.msra.mxu0 %v1066_v8  ;;  %1056 = vmatpush1.bf16.msra.mxu1 %v1066_v8  ;;  %v1072_v24 = vld [vmem:[%s1701_s1 + $0x50] sm:$0xff]   ;;  %v75_v27 = vld [vmem:[%s1699_s2 + $0x88] sm:$0xff]  ;;  %v74_v28 = vld [vmem:[%s1699_s2 + $0x80] sm:$0xff] }
   0xa   :  { %117 = vperm.xlu1 %1060, %v63_v9   ;;  %112 = vperm.xlu0 %1059, %v62_v10   ;;  %v72_v26 = vld [vmem:[%s1699_s2 + $0x70] sm:$0xff]  ;;  %v1073_v29 = vld [vmem:[%s1701_s1 + $0x18] sm:$0xff]   ;;  %v79_v33 = vld [vmem:[%s1699_s2 + $0xa8] sm:$0xff] }
   0xb   :  { %v1074_v30 = vld [vmem:[%s1701_s1 + $0x58] sm:$0xff]   ;;  %v76_v32 = vld [vmem:[%s1699_s2 + $0x90] sm:$0xff]  ;;  %v78_v34 = vld [vmem:[%s1699_s2 + $0xa0] sm:$0xff] }
   0xc   :  { %1037 = vmatmul.mubr.msk.bf16.vlgmr.msra.gmra.mrb[0].mxu0 %vm350_vm0, %v1067_v11  ;;  %1045 = vmatmul.mubr.msk.bf16.vlgmr.msra.gmra.mrb[0].mxu1 %vm350_vm0, %v1068_v12  ;;  %v77_v31 = vld [vmem:[%s1699_s2 + $0x98] sm:$0xff]  ;;  %v1075_v35 = vld [vmem:[%s1701_s1 + $0x20] sm:$0xff]   ;;  %v80_v38 = vld [vmem:[%s1699_s2 + $0xb0] sm:$0xff] }
   0xd   :  { %441 = vmatprep.mubr.bf16.mxu0 %v1083_v0  ;;  %521 = vmatprep.mubr.bf16.mxu1 %v1083_v0  ;;  %v1076_v36 = vld [vmem:[%s1701_s1 + $0x60] sm:$0xff]   ;;  %v81_v37 = vld [vmem:[%s1699_s2 + $0xb8] sm:$0xff]  ;;  %v83_v39 = vld [vmem:[%s1699_s2 + $0xc8] sm:$0xff] }
   0xe   :  { %127 = vperm.xlu1 %1060, %v65_v13   ;;  %122 = vperm.xlu0 %1059, %v64_v14   ;;  %v82_v40 = vld [vmem:[%s1699_s2 + $0xc0] sm:$0xff]  ;;  %v1077_v41 = vld [vmem:[%s1701_s1 + $0x28] sm:$0xff]   ;;  %v84_v44 = vld [vmem:[%s1699_s2 + $0xd0] sm:$0xff] }
   0xf   :  { %v1078_v42 = vld [vmem:[%s1701_s1 + $0x68] sm:$0xff]   ;;  %v656_v43 = vld [vmem:[%s1702_s3] sm:$0xff]  ;;  %v658_v45 = vld [vmem:[%s1702_s3 + $0x10] sm:$0xff] }
  0x10   :  { %v657_v46 = vld [vmem:[%s1702_s3 + $0x8] sm:$0xff]  ;;  %v1079_v47 = vld [vmem:[%s1701_s1 + $0x30] sm:$0xff]   ;;  %v660_v49 = vld [vmem:[%s1702_s3 + $0x20] sm:$0xff] }
  0x11   :  { %v1080_v48 = vld [vmem:[%s1701_s1 + $0x70] sm:$0xff]   ;;  %v659_v50 = vld [vmem:[%s1702_s3 + $0x18] sm:$0xff]  ;;  %v661_v52 = vld [vmem:[%s1702_s3 + $0x28] sm:$0xff] }
  0x12   :  { %137 = vperm.xlu1 %1060, %v67_v15   ;;  %132 = vperm.xlu0 %1059, %v66_v16   ;;  %v662_v51 = vld [vmem:[%s1702_s3 + $0x30] sm:$0xff]  ;;  %v1081_v53 = vld [vmem:[%s1701_s1 + $0x38] sm:$0xff]   ;;  %v664_v55 = vld [vmem:[%s1702_s3 + $0x40] sm:$0xff] }
  0x13   :  { %v1082_v54 = vld [vmem:[%s1701_s1 + $0x78] sm:$0xff]   ;;  %v666_v57 = vld [vmem:[%s1702_s3 + $0x50] sm:$0xff]  ;;  %v665_v58 = vld [vmem:[%s1702_s3 + $0x48] sm:$0xff] }
  0x14   :  { %1038 = vmatmul.mubr.msk.bf16.gmra.mrb[4].mxu0 %vm350_vm0, %v1069_v17  ;;  %1046 = vmatmul.mubr.msk.bf16.gmra.mrb[4].mxu1 %vm350_vm0, %v1070_v18  ;;  %v663_v56 = vld [vmem:[%s1702_s3 + $0x38] sm:$0xff]  ;;  %v668_v59 = vld [vmem:[%s1702_s3 + $0x60] sm:$0xff]  ;;  %v670_v61 = vld [vmem:[%s1702_s3 + $0x70] sm:$0xff] }
  0x15   :  { %451 = vmatprep.mubr.bf16.mxu0 %v1083_v0  ;;  %531 = vmatprep.mubr.bf16.mxu1 %v1083_v0  ;;  %v667_v60 = vld [vmem:[%s1702_s3 + $0x58] sm:$0xff]  ;;  %v669_v62 = vld [vmem:[%s1702_s3 + $0x68] sm:$0xff]  ;;  %v672_v63 = vld [vmem:[%s1702_s3 + $0x80] sm:$0xff] }
  0x16   :  { %147 = vperm.xlu1 %1060, %v69_v19   ;;  %142 = vperm.xlu0 %1059, %v68_v20   ;;  %v674_v1 = vld [vmem:[%s1702_s3 + $0x90] sm:$0xff]  ;;  %v673_v2 = vld [vmem:[%s1702_s3 + $0x88] sm:$0xff]  ;;  %v676_v3 = vld [vmem:[%s1702_s3 + $0xa0] sm:$0xff] }
  0x17   :  { %v675_v4 = vld [vmem:[%s1702_s3 + $0x98] sm:$0xff]  ;;  %v678_v5 = vld [vmem:[%s1702_s3 + $0xb0] sm:$0xff]  ;;  %v677_v6 = vld [vmem:[%s1702_s3 + $0xa8] sm:$0xff] }
  0x18   :  { %v680_v7 = vld [vmem:[%s1702_s3 + $0xc0] sm:$0xff]  ;;  %v679_v8 = vld [vmem:[%s1702_s3 + $0xb8] sm:$0xff]  ;;  %v681_v9 = vld [vmem:[%s1702_s3 + $0xc8] sm:$0xff] }
  0x19   :  { %v85_v10 = vld [vmem:[%s1699_s2 + $0xd8] sm:$0xff]  ;;  %v682_v11 = vld [vmem:[%s1702_s3 + $0xd0] sm:$0xff]  ;;  %v86_v12 = vld [vmem:[%s1699_s2 + $0xe0] sm:$0xff] }
  0x1a   :  { %157 = vperm.xlu1 %1060, %v71_v21   ;;  %152 = vperm.xlu0 %1059, %v70_v22   ;;  %v683_v13 = vld [vmem:[%s1702_s3 + $0xd8] sm:$0xff]  ;;  %v87_v14 = vld [vmem:[%s1699_s2 + $0xe8] sm:$0xff]  ;;  %v684_v15 = vld [vmem:[%s1702_s3 + $0xe0] sm:$0xff] }
  0x1b   :  { %v88_v16 = vld [vmem:[%s1699_s2 + $0xf0] sm:$0xff]  ;;  %v685_v17 = vld [vmem:[%s1702_s3 + $0xe8] sm:$0xff]  ;;  %v89_v18 = vld [vmem:[%s1699_s2 + $0xf8] sm:$0xff] }
  0x1c   :  { %1039 = vmatmul.mubr.msk.bf16.gmra.mrb[8].mxu0 %vm350_vm0, %v1071_v23  ;;  %1047 = vmatmul.mubr.msk.bf16.gmra.mrb[8].mxu1 %vm350_vm0, %v1072_v24  ;;  %v687_v19 = vld [vmem:[%s1702_s3 + $0xf8] sm:$0xff]  ;;  %v686_v20 = vld [vmem:[%s1702_s3 + $0xf0] sm:$0xff] }
  0x1d   :  { %461 = vmatprep.mubr.bf16.mxu0 %v1083_v0  ;;  %541 = vmatprep.mubr.bf16.mxu1 %v1083_v0 }
  0x1e   :  { %167 = vperm.xlu1 %1060, %v73_v25   ;;  %162 = vperm.xlu0 %1059, %v72_v26  }
  0x22   :  { %177 = vperm.xlu1 %1060, %v75_v27   ;;  %172 = vperm.xlu0 %1059, %v74_v28  }
  0x24   :  { %1040 = vmatmul.mubr.msk.bf16.gmra.mrb[12].mxu0 %vm350_vm0, %v1073_v29  ;;  %1048 = vmatmul.mubr.msk.bf16.gmra.mrb[12].mxu1 %vm350_vm0, %v1074_v30 }
  0x25   :  { %471 = vmatprep.mubr.bf16.mxu0 %v1083_v0  ;;  %551 = vmatprep.mubr.bf16.mxu1 %v1083_v0 }
  0x26   :  { %187 = vperm.xlu1 %1060, %v77_v31   ;;  %182 = vperm.xlu0 %1059, %v76_v32  }
  0x2a   :  { %197 = vperm.xlu1 %1060, %v79_v33   ;;  %192 = vperm.xlu0 %1059, %v78_v34  }
  0x2c   :  { %1041 = vmatmul.mubr.msk.bf16.gmra.mrb[16].mxu0 %vm350_vm0, %v1075_v35  ;;  %1049 = vmatmul.mubr.msk.bf16.gmra.mrb[16].mxu1 %vm350_vm0, %v1076_v36 }
  0x2d   :  { %481 = vmatprep.mubr.bf16.mxu0 %v1083_v0  ;;  %561 = vmatprep.mubr.bf16.mxu1 %v1083_v0 }
  0x2e   :  { %207 = vperm.xlu1 %1060, %v81_v37   ;;  %202 = vperm.xlu0 %1059, %v80_v38  }
  0x32   :  { %217 = vperm.xlu1 %1060, %v83_v39   ;;  %212 = vperm.xlu0 %1059, %v82_v40  }
  0x34   :  { %1042 = vmatmul.mubr.msk.bf16.gmra.mrb[20].mxu0 %vm350_vm0, %v1077_v41  ;;  %1050 = vmatmul.mubr.msk.bf16.gmra.mrb[20].mxu1 %vm350_vm0, %v1078_v42 }
  0x35   :  { %491 = vmatprep.mubr.bf16.mxu0 %v1083_v0  ;;  %571 = vmatprep.mubr.bf16.mxu1 %v1083_v0 }
  0x36   :  { %690 = vperm.xlu1 %1060, %v656_v43   ;;  %222 = vperm.xlu0 %1059, %v84_v44  }
  0x3a   :  { %700 = vperm.xlu1 %1060, %v658_v45   ;;  %695 = vperm.xlu0 %1059, %v657_v46  }
  0x3c   :  { %1043 = vmatmul.mubr.msk.bf16.gmra.mrb[24].mxu0 %vm350_vm0, %v1079_v47  ;;  %1051 = vmatmul.mubr.msk.bf16.gmra.mrb[24].mxu1 %vm350_vm0, %v1080_v48 }
  0x3d   :  { %501 = vmatprep.mubr.bf16.mxu0 %v1083_v0  ;;  %581 = vmatprep.mubr.bf16.mxu1 %v1083_v0  ;;  %v671_v0 = vld [vmem:[%s1702_s3 + $0x78] sm:$0xff] }
  0x3e   :  { %710 = vperm.xlu1 %1060, %v660_v49   ;;  %705 = vperm.xlu0 %1059, %v659_v50  }
  0x42   :  { %720 = vperm.xlu1 %1060, %v662_v51   ;;  %715 = vperm.xlu0 %1059, %v661_v52  }
  0x44   :  { %1044 = vmatmul.mubr.msk.bf16.gmra.mrb[28].mxu0 %vm350_vm0, %v1081_v53  ;;  %1052 = vmatmul.mubr.msk.bf16.gmra.mrb[28].mxu1 %vm350_vm0, %v1082_v54 }
  0x46   :  { %730 = vperm.xlu1 %1060, %v664_v55   ;;  %725 = vperm.xlu0 %1059, %v663_v56  }
  0x4a   :  { %740 = vperm.xlu1 %1060, %v666_v57   ;;  %735 = vperm.xlu0 %1059, %v665_v58  }
  0x4e   :  { %750 = vperm.xlu1 %1060, %v668_v59   ;;  %745 = vperm.xlu0 %1059, %v667_v60  }
  0x52   :  { %760 = vperm.xlu1 %1060, %v670_v61   ;;  %755 = vperm.xlu0 %1059, %v669_v62  }
  0x56   :  { %770 = vperm.xlu1 %1060, %v672_v63   ;;  %765 = vperm.xlu0 %1059, %v671_v0  }
  0x5a   :  { %780 = vperm.xlu1 %1060, %v674_v1   ;;  %775 = vperm.xlu0 %1059, %v673_v2  }
  0x5e   :  { %790 = vperm.xlu1 %1060, %v676_v3   ;;  %785 = vperm.xlu0 %1059, %v675_v4  }
  0x62   :  { %800 = vperm.xlu1 %1060, %v678_v5   ;;  %795 = vperm.xlu0 %1059, %v677_v6  }
  0x66   :  { %810 = vperm.xlu1 %1060, %v680_v7   ;;  %805 = vperm.xlu0 %1059, %v679_v8  }
  0x6a   :  { %815 = vperm.xlu1 %1060, %v681_v9   ;;  %227 = vperm.xlu0 %1059, %v85_v10  }
  0x6e   :  { %820 = vperm.xlu1 %1060, %v682_v11   ;;  %232 = vperm.xlu0 %1059, %v86_v12  }
  0x72   :  { %825 = vperm.xlu1 %1060, %v683_v13   ;;  %237 = vperm.xlu0 %1059, %v87_v14  }
  0x76   :  { %830 = vperm.xlu1 %1060, %v684_v15   ;;  %242 = vperm.xlu0 %1059, %v88_v16  }
  0x7a   :  { %835 = vperm.xlu1 %1060, %v685_v17   ;;  %247 = vperm.xlu0 %1059, %v89_v18  }
  0x7e   :  { %845 = vperm.xlu1 %1060, %v687_v19   ;;  %840 = vperm.xlu0 %1059, %v686_v20  }
  0x81   :  { %v1401_v21 = vpop.permute.xlu1 %102  ;;  %v93_v22 = vpop.permute.xlu0 %92 }
  0x85   :  { %v1403_v23 = vpop.permute.xlu1 %107  ;;  %v98_v24 = vpop.permute.xlu0 %97 }
  0x89   :  { %v1405_v25 = vpop.permute.xlu1 %117  ;;  %v1407_v26 = vpop.permute.xlu0 %112 }
  0x8d   :  { %v1409_v27 = vpop.permute.xlu1 %127  ;;  %v1411_v28 = vpop.permute.xlu0 %122 }
  0x91   :  { %v1413_v29 = vpop.permute.xlu1 %137  ;;  %v1415_v30 = vpop.permute.xlu0 %132 }
  0x95   :  { %v1417_v31 = vpop.permute.xlu1 %147  ;;  %v1419_v32 = vpop.permute.xlu0 %142 }
  0x99   :  { %v1421_v33 = vpop.permute.xlu1 %157  ;;  %v1423_v34 = vpop.permute.xlu0 %152 }
  0x9d   :  { %v1425_v35 = vpop.permute.xlu1 %167  ;;  %v1427_v36 = vpop.permute.xlu0 %162 }
  0xa1   :  { %v1429_v37 = vpop.permute.xlu1 %177  ;;  %v1431_v38 = vpop.permute.xlu0 %172 }
  0xa5   :  { %v1433_v39 = vpop.permute.xlu1 %187  ;;  %v1435_v40 = vpop.permute.xlu0 %182 }
  0xa9   :  { %v1437_v41 = vpop.permute.xlu1 %197  ;;  %v1439_v42 = vpop.permute.xlu0 %192 }
  0xad   :  { %v1441_v43 = vpop.permute.xlu1 %207  ;;  %v1443_v44 = vpop.permute.xlu0 %202 }
  0xb1   :  { %v1445_v45 = vpop.permute.xlu1 %217  ;;  %v1447_v46 = vpop.permute.xlu0 %212 }
  0xb2   :  { %1708 = vst [vmem:[#allocation3_spill] sm:$0xff] %v1445_v45  ;;  %1709 = vst [vmem:[#allocation4_spill] sm:$0xff] %v1447_v46 }
  0xb5   :  { %v691_v47 = vpop.permute.xlu1 %690  ;;  %v1449_v48 = vpop.permute.xlu0 %222 }
  0xb6   :  { %1710 = vst [vmem:[#allocation5_spill] sm:$0xff] %v1449_v48 }
  0xb9   :  { %v701_v49 = vpop.permute.xlu1 %700  ;;  %v696_v50 = vpop.permute.xlu0 %695 }
  0xbd   :  { %v1451_v51 = vpop.permute.xlu1 %710  ;;  %v706_v52 = vpop.permute.xlu0 %705 }
  0xc1   :  { %v1453_v53 = vpop.permute.xlu1 %720  ;;  %v1455_v54 = vpop.permute.xlu0 %715 }
  0xc5   :  { %v1457_v55 = vpop.permute.xlu1 %730  ;;  %v1459_v56 = vpop.permute.xlu0 %725 }
  0xc9   :  { %v1461_v57 = vpop.permute.xlu1 %740  ;;  %v1463_v58 = vpop.permute.xlu0 %735 }
  0xcd   :  { %v1473_v10 = vpop.permute.xlu1 %750  ;;  %v1475_v11 = vpop.permute.xlu0 %745 }
  0xdf   :  { %v433_v59 = vpop.f32.mrb[0].mxu0  ;;  %v1465_v60 = vpop.f32.mrb[0].mxu1 }
  0xe0   :  { %v434_v61 = vadd.f32 %v433_v59, %v93_v22  ;;  %v435_v62 = vpop.f32.mrb[1].mxu0  ;;  %v1467_v63 = vpop.f32.mrb[1].mxu1 }
  0xe1   :  { %v436_v0 = vadd.f32 %v435_v62, %v93_v22  ;;  %v437_v1 = vpop.f32.mrb[2].mxu0  ;;  %v1469_v2 = vpop.f32.mrb[2].mxu1 }
  0xe2   :  { %v592_v3 = vmax.f32 %v434_v61, 0.0  ;;  %v438_v4 = vadd.f32 %v437_v1, %v98_v24  ;;  %v439_v5 = vpop.f32.mrb[3].mxu0  ;;  %v1471_v6 = vpop.f32.mrb[3].mxu1 }
  0xe3   :  { %v593_v7 = vmax.f32 %v436_v0, 0.0  ;;  %v440_v8 = vadd.f32 %v439_v5, %v98_v24 }
  0xe4   :  { %v594_v9 = vmax.f32 %v438_v4, 0.0  ;;  %v848_v13 = vmul.f32 %v691_v47, %v592_v3 }
  0xe5   :  { %v595_v12 = vmax.f32 %v440_v8, 0.0  ;;  %v849_v17 = vmul.f32 %v691_v47, %v593_v7 }
  0xe6   :  { %v850_v14 = vmul.f32 %v696_v50, %v594_v9 }
  0xe7   :  { %v443_v15 = vpop.f32.mrb[4].mxu0  ;;  %v1477_v16 = vpop.f32.mrb[4].mxu1  ;;  %v851_v18 = vmul.f32 %v696_v50, %v595_v12 }
  0xe8   :  { %v444_v19 = vadd.f32 %v443_v15, %v1401_v21  ;;  %v445_v20 = vpop.f32.mrb[5].mxu0  ;;  %v1480_v22 = vpop.f32.mrb[5].mxu1  ;;  %v912_v59 = vadd.f32 %v850_v14, %v848_v13 }
  0xe9   :  { %v446_v24 = vadd.f32 %v445_v20, %v1401_v21  ;;  %v949_v61 = vadd.f32 %v851_v18, %v849_v17  ;;  %v447_v0 = vpop.f32.mrb[6].mxu0  ;;  %v1483_v1 = vpop.f32.mrb[6].mxu1 }
  0xea   :  { %v596_v62 = vmax.f32 %v444_v19, 0.0  ;;  %v448_v4 = vadd.f32 %v447_v0, %v1403_v23  ;;  %v449_v5 = vpop.f32.mrb[7].mxu0  ;;  %v1486_v8 = vpop.f32.mrb[7].mxu1 }
  0xeb   :  { %v597_v3 = vmax.f32 %v446_v24, 0.0  ;;  %v450_v50 = vadd.f32 %v449_v5, %v1403_v23  ;;  %v1489_v12 = vpop.permute.xlu1 %760  ;;  %v1491_v13 = vpop.permute.xlu0 %755 }
  0xec   :  { %v852_v47 = vmul.f32 %v701_v49, %v596_v62  ;;  %v598_v9 = vmax.f32 %v448_v4, 0.0 }
  0xed   :  { %v853_v7 = vmul.f32 %v701_v49, %v597_v3  ;;  %v599_v14 = vmax.f32 %v450_v50, 0.0 }
  0xee   :  { %v913_v21 = vadd.f32 %v912_v59, %v852_v47  ;;  %v854_v17 = vmul.f32 %v706_v52, %v598_v9 }
  0xef   :  { %v950_v15 = vadd.f32 %v949_v61, %v853_v7  ;;  %v453_v18 = vpop.f32.mrb[8].mxu0  ;;  %v1493_v19 = vpop.f32.mrb[8].mxu1  ;;  %v855_v20 = vmul.f32 %v706_v52, %v599_v14 }
  0xf0   :  { %v454_v24 = vadd.f32 %v453_v18, %v1407_v26  ;;  %v455_v0 = vpop.f32.mrb[9].mxu0  ;;  %v1496_v62 = vpop.f32.mrb[9].mxu1  ;;  %v914_v23 = vadd.f32 %v913_v21, %v854_v17 }
  0xf1   :  { %v456_v49 = vadd.f32 %v455_v0, %v1407_v26  ;;  %v951_v3 = vadd.f32 %v950_v15, %v855_v20  ;;  %v457_v5 = vpop.f32.mrb[10].mxu0  ;;  %v1499_v48 = vpop.f32.mrb[10].mxu1 }
  0xf2   :  { %v600_v4 = vmax.f32 %v454_v24, 0.0  ;;  %v458_v61 = vadd.f32 %v457_v5, %v1405_v25  ;;  %v459_v47 = vpop.f32.mrb[11].mxu0  ;;  %v1502_v50 = vpop.f32.mrb[11].mxu1 }
  0xf3   :  { %v601_v59 = vmax.f32 %v456_v49, 0.0  ;;  %v460_v7 = vadd.f32 %v459_v47, %v1405_v25  ;;  %v1507_v14 = vpop.permute.xlu1 %770  ;;  %v1509_v26 = vpop.permute.xlu0 %765 }
  0xf4   :  { %v856_v52 = vmul.f32 %v1451_v51, %v600_v4  ;;  %v602_v21 = vmax.f32 %v458_v61, 0.0 }
  0xf5   :  { %v857_v9 = vmul.f32 %v1451_v51, %v601_v59  ;;  %v603_v17 = vmax.f32 %v460_v7, 0.0 }
  0xf6   :  { %v915_v15 = vadd.f32 %v914_v23, %v856_v52  ;;  %v858_v20 = vmul.f32 %v1455_v54, %v602_v21 }
  0xf7   :  { %v952_v18 = vadd.f32 %v951_v3, %v857_v9  ;;  %v463_v24 = vpop.f32.mrb[12].mxu0  ;;  %v1512_v0 = vpop.f32.mrb[12].mxu1  ;;  %v859_v49 = vmul.f32 %v1455_v54, %v603_v17 }
  0xf8   :  { %v464_v4 = vadd.f32 %v463_v24, %v1411_v28  ;;  %v465_v25 = vpop.f32.mrb[13].mxu0  ;;  %v1516_v5 = vpop.f32.mrb[13].mxu1  ;;  %v916_v51 = vadd.f32 %v915_v15, %v858_v20 }
  0xf9   :  { %v466_v59 = vadd.f32 %v465_v25, %v1411_v28  ;;  %v953_v61 = vadd.f32 %v952_v18, %v859_v49  ;;  %v467_v23 = vpop.f32.mrb[14].mxu0  ;;  %v1519_v52 = vpop.f32.mrb[14].mxu1 }
  0xfa   :  { %v604_v47 = vmax.f32 %v464_v4, 0.0  ;;  %v468_v7 = vadd.f32 %v467_v23, %v1409_v27  ;;  %v469_v9 = vpop.f32.mrb[15].mxu0  ;;  %v1522_v21 = vpop.f32.mrb[15].mxu1 }
  0xfb   :  { %v605_v3 = vmax.f32 %v466_v59, 0.0  ;;  %v470_v17 = vadd.f32 %v469_v9, %v1409_v27  ;;  %v1527_v20 = vpop.permute.xlu1 %780  ;;  %v1529_v28 = vpop.permute.xlu0 %775 }
  0xfc   :  { %v860_v54 = vmul.f32 %v1453_v53, %v604_v47  ;;  %v606_v15 = vmax.f32 %v468_v7, 0.0 }
  0xfd   :  { %v861_v24 = vmul.f32 %v1453_v53, %v605_v3  ;;  %v607_v49 = vmax.f32 %v470_v17, 0.0 }
  0xfe   :  { %v917_v18 = vadd.f32 %v916_v51, %v860_v54  ;;  %v862_v25 = vmul.f32 %v1459_v56, %v606_v15 }
  0xff   :  { %v954_v4 = vadd.f32 %v953_v61, %v861_v24  ;;  %v473_v59 = vpop.f32.mrb[16].mxu0  ;;  %v1532_v23 = vpop.f32.mrb[16].mxu1  ;;  %v863_v45 = vmul.f32 %v1459_v56, %v607_v49 }
 0x100   :  { %v474_v47 = vadd.f32 %v473_v59, %v1415_v30  ;;  %v475_v27 = vpop.f32.mrb[17].mxu0  ;;  %v1536_v9 = vpop.f32.mrb[17].mxu1  ;;  %v918_v53 = vadd.f32 %v917_v18, %v862_v25 }
 0x101   :  { %v476_v3 = vadd.f32 %v475_v27, %v1415_v30  ;;  %v477_v7 = vpop.f32.mrb[18].mxu0  ;;  %v1539_v46 = vpop.f32.mrb[18].mxu1  ;;  %v955_v51 = vadd.f32 %v954_v4, %v863_v45 }
 0x102   :  { %1711 = vst [vmem:[#allocation6_spill] sm:$0xff] %v1539_v46  ;;  %v608_v61 = vmax.f32 %v474_v47, 0.0  ;;  %v478_v54 = vadd.f32 %v477_v7, %v1413_v29  ;;  %v479_v17 = vpop.f32.mrb[19].mxu0  ;;  %v1542_v24 = vpop.f32.mrb[19].mxu1 }
 0x103   :  { %1712 = vst [vmem:[#allocation7_spill] sm:$0xff] %v1542_v24  ;;  %v609_v15 = vmax.f32 %v476_v3, 0.0  ;;  %v480_v56 = vadd.f32 %v479_v17, %v1413_v29  ;;  %v1547_v30 = vpop.permute.xlu1 %790  ;;  %v1549_v27 = vpop.permute.xlu0 %785 }
 0x104   :  { %v864_v49 = vmul.f32 %v1457_v55, %v608_v61  ;;  %v610_v59 = vmax.f32 %v478_v54, 0.0 }
 0x105   :  { %v865_v18 = vmul.f32 %v1457_v55, %v609_v15  ;;  %v611_v25 = vmax.f32 %v480_v56, 0.0 }
 0x106   :  { %v919_v45 = vadd.f32 %v918_v53, %v864_v49  ;;  %v866_v4 = vmul.f32 %v1463_v58, %v610_v59 }
 0x107   :  { %v956_v47 = vadd.f32 %v955_v51, %v865_v18  ;;  %v867_v7 = vmul.f32 %v1463_v58, %v611_v25  ;;  %v483_v24 = vpop.f32.mrb[20].mxu0  ;;  %v1553_v3 = vpop.f32.mrb[20].mxu1 }
 0x108   :  { %v920_v29 = vadd.f32 %v919_v45, %v866_v4  ;;  %v484_v61 = vadd.f32 %v483_v24, %v1419_v32  ;;  %v485_v54 = vpop.f32.mrb[21].mxu0  ;;  %v1556_v17 = vpop.f32.mrb[21].mxu1 }
 0x109   :  { %v957_v55 = vadd.f32 %v956_v47, %v867_v7  ;;  %v486_v15 = vadd.f32 %v485_v54, %v1419_v32  ;;  %v487_v56 = vpop.f32.mrb[22].mxu0  ;;  %v1559_v46 = vpop.f32.mrb[22].mxu1 }
 0x10a   :  { %1713 = vst [vmem:[#allocation8_spill] sm:$0xff] %v1559_v46  ;;  %v612_v53 = vmax.f32 %v484_v61, 0.0  ;;  %v488_v51 = vadd.f32 %v487_v56, %v1417_v31  ;;  %v489_v49 = vpop.f32.mrb[23].mxu0  ;;  %v1562_v58 = vpop.f32.mrb[23].mxu1 }
 0x10b   :  { %1714 = vst [vmem:[#allocation9_spill] sm:$0xff] %v1562_v58  ;;  %v613_v59 = vmax.f32 %v486_v15, 0.0  ;;  %v490_v18 = vadd.f32 %v489_v49, %v1417_v31  ;;  %v1567_v47 = vpop.permute.xlu1 %800  ;;  %v1569_v32 = vpop.permute.xlu0 %795 }
 0x10c   :  { %v868_v24 = vmul.f32 %v1461_v57, %v612_v53  ;;  %v614_v25 = vmax.f32 %v488_v51, 0.0 }
 0x10d   :  { %v869_v45 = vmul.f32 %v1461_v57, %v613_v59  ;;  %v615_v4 = vmax.f32 %v490_v18, 0.0 }
 0x10e   :  { %v921_v7 = vadd.f32 %v920_v29, %v868_v24  ;;  %v870_v61 = vmul.f32 %v1475_v11, %v614_v25 }
 0x10f   :  { %v958_v54 = vadd.f32 %v957_v55, %v869_v45  ;;  %v871_v56 = vmul.f32 %v1475_v11, %v615_v4  ;;  %v493_v58 = vpop.f32.mrb[24].mxu0  ;;  %v1573_v15 = vpop.f32.mrb[24].mxu1 }
 0x110   :  { %v922_v31 = vadd.f32 %v921_v7, %v870_v61  ;;  %v494_v53 = vadd.f32 %v493_v58, %v1423_v34  ;;  %v495_v51 = vpop.f32.mrb[25].mxu0  ;;  %v1576_v49 = vpop.f32.mrb[25].mxu1 }
 0x111   :  { %v959_v57 = vadd.f32 %v958_v54, %v871_v56  ;;  %v496_v59 = vadd.f32 %v495_v51, %v1423_v34  ;;  %v497_v18 = vpop.f32.mrb[26].mxu0  ;;  %v1579_v46 = vpop.f32.mrb[26].mxu1 }
 0x112   :  { %v616_v29 = vmax.f32 %v494_v53, 0.0  ;;  %v498_v55 = vadd.f32 %v497_v18, %v1421_v33  ;;  %v499_v24 = vpop.f32.mrb[27].mxu0  ;;  %v1582_v11 = vpop.f32.mrb[27].mxu1 }
 0x113   :  { %1715 = vst [vmem:[#allocation10_spill] sm:$0xff] %v1582_v11  ;;  %v617_v25 = vmax.f32 %v496_v59, 0.0  ;;  %v500_v45 = vadd.f32 %v499_v24, %v1421_v33  ;;  %v1587_v54 = vpop.permute.xlu1 %810  ;;  %v1589_v34 = vpop.permute.xlu0 %805  ;;  %v514_v33 = vadd.f32 %v1465_v60, %v1431_v38 }
 0x114   :  { %v872_v58 = vmul.f32 %v1473_v10, %v616_v29  ;;  %v618_v4 = vmax.f32 %v498_v55, 0.0 }
 0x115   :  { %v873_v7 = vmul.f32 %v1473_v10, %v617_v25  ;;  %v619_v61 = vmax.f32 %v500_v45, 0.0 }
 0x116   :  { %v923_v56 = vadd.f32 %v922_v31, %v872_v58  ;;  %v874_v53 = vmul.f32 %v1491_v13, %v618_v4  ;;  %v516_v31 = vadd.f32 %v1467_v63, %v1431_v38  ;;  %v518_v58 = vadd.f32 %v1469_v2, %v1429_v37 }
 0x117   :  { %v960_v51 = vadd.f32 %v959_v57, %v873_v7  ;;  %v875_v18 = vmul.f32 %v1491_v13, %v619_v61  ;;  %v503_v11 = vpop.f32.mrb[28].mxu0  ;;  %v1593_v59 = vpop.f32.mrb[28].mxu1  ;;  %v520_v61 = vadd.f32 %v1471_v6, %v1429_v37  ;;  %v624_v63 = vmax.f32 %v514_v33, 0.0 }
 0x118   :  { %v924_v29 = vadd.f32 %v923_v56, %v874_v53  ;;  %v504_v10 = vadd.f32 %v503_v11, %v1427_v36  ;;  %v505_v55 = vpop.f32.mrb[29].mxu0  ;;  %v1598_v24 = vpop.f32.mrb[29].mxu1  ;;  %v625_v2 = vmax.f32 %v516_v31, 0.0  ;;  %v626_v37 = vmax.f32 %v518_v58, 0.0 }
 0x119   :  { %v961_v25 = vadd.f32 %v960_v51, %v875_v18  ;;  %v506_v57 = vadd.f32 %v505_v55, %v1427_v36  ;;  %v507_v45 = vpop.f32.mrb[30].mxu0  ;;  %v1603_v13 = vpop.f32.mrb[30].mxu1  ;;  %v524_v36 = vadd.f32 %v1477_v16, %v1435_v40  ;;  %v526_v18 = vadd.f32 %v1480_v22, %v1435_v40 }
 0x11a   :  { %v620_v4 = vmax.f32 %v504_v10, 0.0  ;;  %v508_v60 = vadd.f32 %v507_v45, %v1425_v35  ;;  %v509_v7 = vpop.f32.mrb[31].mxu0  ;;  %v1608_v11 = vpop.f32.mrb[31].mxu1  ;;  %v627_v16 = vmax.f32 %v520_v61, 0.0  ;;  %v530_v31 = vadd.f32 %v1486_v8, %v1433_v39 }
 0x11b   :  { %v621_v56 = vmax.f32 %v506_v57, 0.0  ;;  %v510_v38 = vadd.f32 %v509_v7, %v1425_v35  ;;  %v1618_v10 = vpop.permute.xlu0 %227  ;;  %v528_v35 = vadd.f32 %v1483_v1, %v1433_v39  ;;  %v1624_v57 = vpop.permute.xlu1 %815  ;;  %v880_v22 = vmul.f32 %v1507_v14, %v624_v63 }
 0x11c   :  { %v876_v53 = vmul.f32 %v1489_v12, %v620_v4  ;;  %v622_v51 = vmax.f32 %v508_v60, 0.0  ;;  %v534_v58 = vadd.f32 %v1493_v19, %v1439_v42  ;;  %v881_v1 = vmul.f32 %v1507_v14, %v625_v2 }
 0x11d   :  { %v877_v55 = vmul.f32 %v1489_v12, %v621_v56  ;;  %v623_v45 = vmax.f32 %v510_v38, 0.0  ;;  %v628_v12 = vmax.f32 %v524_v36, 0.0  ;;  %v536_v7 = vadd.f32 %v1496_v62, %v1439_v42 }
 0x11e   :  { %v925_v6 = vadd.f32 %v924_v29, %v876_v53  ;;  %v878_v33 = vmul.f32 %v1509_v26, %v622_v51  ;;  %v629_v29 = vmax.f32 %v526_v18, 0.0  ;;  %v882_v56 = vmul.f32 %v1529_v28, %v626_v37 }
 0x11f   :  { %v962_v4 = vadd.f32 %v961_v25, %v877_v55  ;;  %v879_v40 = vmul.f32 %v1509_v26, %v623_v45  ;;  %v630_v39 = vmax.f32 %v528_v35, 0.0  ;;  %v538_v8 = vadd.f32 %v1499_v48, %v1437_v41  ;;  %v233_v63 = vpop.permute.xlu0 %232  ;;  %v1645_v2 = vpop.permute.xlu1 %820 }
 0x120   :  { %v926_v60 = vadd.f32 %v925_v6, %v878_v33  ;;  %v883_v25 = vmul.f32 %v1529_v28, %v627_v16  ;;  %v631_v38 = vmax.f32 %v530_v31, 0.0  ;;  %v540_v19 = vadd.f32 %v1502_v50, %v1437_v41  ;;  %v1716_v16 = vld [vmem:[#allocation4_spill] sm:$0xff] }
 0x121   :  { %v963_v61 = vadd.f32 %v962_v4, %v879_v40  ;;  %v884_v36 = vmul.f32 %v1527_v20, %v628_v12  ;;  %v632_v53 = vmax.f32 %v534_v58, 0.0  ;;  %v544_v42 = vadd.f32 %v1512_v0, %v1443_v44 }
 0x122   :  { %v927_v26 = vadd.f32 %v926_v60, %v880_v22  ;;  %v885_v51 = vmul.f32 %v1527_v20, %v629_v29  ;;  %v633_v48 = vmax.f32 %v536_v7, 0.0  ;;  %v546_v28 = vadd.f32 %v1516_v5, %v1443_v44  ;;  %v1719_v7 = vld [vmem:[#allocation7_spill] sm:$0xff] }
 0x123   :  { %v964_v14 = vadd.f32 %v963_v61, %v881_v1  ;;  %v886_v55 = vmul.f32 %v1549_v27, %v630_v39  ;;  %v634_v41 = vmax.f32 %v538_v8, 0.0  ;;  %v548_v50 = vadd.f32 %v1519_v52, %v1441_v43  ;;  %v238_v4 = vpop.permute.xlu0 %237  ;;  %v826_v1 = vpop.permute.xlu1 %825 }
 0x124   :  { %v928_v62 = vadd.f32 %v927_v26, %v882_v56  ;;  %v887_v37 = vmul.f32 %v1549_v27, %v631_v38  ;;  %v635_v0 = vmax.f32 %v540_v19, 0.0  ;;  %v550_v20 = vadd.f32 %v1522_v21, %v1441_v43  ;;  %v1717_v43 = vld [vmem:[#allocation3_spill] sm:$0xff]  ;;  %v1718_v21 = vld [vmem:[#allocation6_spill] sm:$0xff] }
 0x125   :  { %v965_v18 = vadd.f32 %v964_v14, %v883_v25  ;;  %v888_v6 = vmul.f32 %v1547_v30, %v632_v53  ;;  %v636_v33 = vmax.f32 %v544_v42, 0.0  ;;  %v554_v44 = vadd.f32 %v1532_v23, %v1716_v16  ;;  %v1721_v53 = vld [vmem:[#allocation8_spill] sm:$0xff] }
 0x126   :  { %v929_v45 = vadd.f32 %v928_v62, %v884_v36  ;;  %v889_v31 = vmul.f32 %v1547_v30, %v633_v48  ;;  %v637_v40 = vmax.f32 %v546_v28, 0.0  ;;  %v556_v52 = vadd.f32 %v1536_v9, %v1716_v16  ;;  %v1720_v9 = vld [vmem:[#allocation5_spill] sm:$0xff] }
 0x127   :  { %v966_v35 = vadd.f32 %v965_v18, %v885_v51  ;;  %v890_v22 = vmul.f32 %v1569_v32, %v634_v41  ;;  %v638_v12 = vmax.f32 %v548_v50, 0.0  ;;  %v558_v58 = vadd.f32 %v1718_v21, %v1717_v43  ;;  %v243_v51 = vpop.permute.xlu0 %242 }
 0x128   :  { %v930_v5 = vadd.f32 %v929_v45, %v886_v55  ;;  %v891_v29 = vmul.f32 %v1569_v32, %v635_v0  ;;  %v639_v23 = vmax.f32 %v550_v20, 0.0  ;;  %v560_v30 = vadd.f32 %v1719_v7, %v1717_v43  ;;  %v831_v45 = vpop.permute.xlu1 %830 }
 0x129   :  { %v967_v27 = vadd.f32 %v966_v35, %v887_v37  ;;  %v892_v56 = vmul.f32 %v1567_v47, %v636_v33  ;;  %v640_v39 = vmax.f32 %v554_v44, 0.0  ;;  %v564_v8 = vadd.f32 %v1553_v3, %v1720_v9  ;;  %v1722_v3 = vld [vmem:[#allocation9_spill] sm:$0xff] }
 0x12a   :  { %v931_v60 = vadd.f32 %v930_v5, %v888_v6  ;;  %v893_v25 = vmul.f32 %v1567_v47, %v637_v40  ;;  %v641_v38 = vmax.f32 %v556_v52, 0.0  ;;  %v566_v19 = vadd.f32 %v1556_v17, %v1720_v9  ;;  %v1723_v5 = vld [vmem:[#allocation10_spill] sm:$0xff] }
 0x12b   :  { %v968_v61 = vadd.f32 %v967_v27, %v889_v31  ;;  %v894_v32 = vmul.f32 %v1589_v34, %v638_v12  ;;  %v642_v36 = vmax.f32 %v558_v58, 0.0  ;;  %v568_v42 = vadd.f32 %v1721_v53, %v1618_v10 }
 0x12c   :  { %v932_v26 = vadd.f32 %v931_v60, %v890_v22  ;;  %v895_v48 = vmul.f32 %v1589_v34, %v639_v23  ;;  %v643_v28 = vmax.f32 %v560_v30, 0.0  ;;  %v570_v18 = vadd.f32 %v1722_v3, %v1618_v10 }
 0x12d   :  { %v969_v14 = vadd.f32 %v968_v61, %v891_v29  ;;  %v896_v55 = vmul.f32 %v1587_v54, %v640_v39  ;;  %v644_v41 = vmax.f32 %v564_v8, 0.0  ;;  %v574_v17 = vadd.f32 %v1573_v15, %v233_v63 }
 0x12e   :  { %v933_v62 = vadd.f32 %v932_v26, %v892_v56  ;;  %v897_v37 = vmul.f32 %v1587_v54, %v641_v38  ;;  %v645_v0 = vmax.f32 %v566_v19, 0.0  ;;  %v576_v20 = vadd.f32 %v1576_v49, %v233_v63  ;;  %v248_v49 = vpop.permute.xlu0 %247 }
 0x12f   :  { %v970_v47 = vadd.f32 %v969_v14, %v893_v25  ;;  %v898_v34 = vmul.f32 %v1624_v57, %v642_v36  ;;  %v646_v6 = vmax.f32 %v568_v42, 0.0  ;;  %v578_v33 = vadd.f32 %v1579_v46, %v238_v4 }
 0x130   :  { %v934_v50 = vadd.f32 %v933_v62, %v894_v32  ;;  %v899_v16 = vmul.f32 %v1624_v57, %v643_v28  ;;  %v647_v44 = vmax.f32 %v570_v18, 0.0  ;;  %v580_v31 = vadd.f32 %v1723_v5, %v238_v4  ;;  %v836_v4 = vpop.permute.xlu1 %835 }
 0x131   :  { %v971_v35 = vadd.f32 %v970_v47, %v895_v48  ;;  %v900_v40 = vmul.f32 %v1645_v2, %v644_v41  ;;  %v648_v52 = vmax.f32 %v574_v17, 0.0  ;;  %v584_v54 = vadd.f32 %v1593_v59, %v243_v51 }
 0x132   :  { %v935_v10 = vadd.f32 %v934_v50, %v896_v55  ;;  %v901_v63 = vmul.f32 %v1645_v2, %v645_v0  ;;  %v649_v22 = vmax.f32 %v576_v20, 0.0  ;;  %v586_v12 = vadd.f32 %v1598_v24, %v243_v51  ;;  %v841_v26 = vpop.permute.xlu0 %840 }
 0x133   :  { %v972_v15 = vadd.f32 %v971_v35, %v897_v37  ;;  %v902_v43 = vmul.f32 %v826_v1, %v646_v6  ;;  %v650_v21 = vmax.f32 %v578_v33, 0.0  ;;  %v588_v57 = vadd.f32 %v1603_v13, %v248_v49 }
 0x134   :  { %v936_v27 = vadd.f32 %v935_v10, %v898_v34  ;;  %v903_v60 = vmul.f32 %v826_v1, %v647_v44  ;;  %v651_v29 = vmax.f32 %v580_v31, 0.0  ;;  %v590_v23 = vadd.f32 %v1608_v11, %v248_v49  ;;  %v846_v1 = vpop.permute.xlu1 %845 }
 0x135   :  { %v973_v46 = vadd.f32 %v972_v15, %v899_v16  ;;  %v904_v59 = vmul.f32 %v831_v45, %v648_v52  ;;  %v652_v30 = vmax.f32 %v584_v54, 0.0  ;;  %v905_v56 = vmul.f32 %v831_v45, %v649_v22 }
 0x136   :  { %v937_v58 = vadd.f32 %v936_v27, %v900_v40  ;;  %v653_v2 = vmax.f32 %v586_v12, 0.0  ;;  %v906_v9 = vmul.f32 %v836_v4, %v650_v21  ;;  %v654_v24 = vmax.f32 %v588_v57, 0.0 }
 0x137   :  { %v974_v7 = vadd.f32 %v973_v46, %v901_v63  ;;  %v907_v25 = vmul.f32 %v836_v4, %v651_v29  ;;  %v655_v38 = vmax.f32 %v590_v23, 0.0  ;;  %v908_v19 = vmul.f32 %v841_v26, %v652_v30 }
 0x138   :  { %v938_v61 = vadd.f32 %v937_v58, %v902_v43  ;;  %v909_v32 = vmul.f32 %v841_v26, %v653_v2  ;;  %v910_v11 = vmul.f32 %v846_v1, %v654_v24  ;;  %v1084_v17 = vmov 1966171168  }
 0x139   :  { %v975_v39 = vadd.f32 %v974_v7, %v903_v60  ;;  %v911_v42 = vmul.f32 %v846_v1, %v655_v38  ;;  %v994_v50 = vunpack.c.l.s4 %v1084_v17  ;;  %v996_v45 = vlaneseq }
 0x13a   :  { %v939_v8 = vadd.f32 %v938_v61, %v904_v59  ;;  %v987_v35 = vstv %s1703_s4 }
 0x13b   :  { %v976_v13 = vadd.f32 %v975_v39, %v905_v56  ;;  %v995_v6 = vunpack.c.0.s8 %v994_v50  ;;  %v997_v33 = vshrl.u32 %v996_v45, 7  ;;  %vm1010_vm1 = vcmp.lt.s32.totalorder %v996_v45, 256 }
 0x13c   :  { %v940_v14 = vadd.f32 %v939_v8, %v906_v9 }
 0x13d   :  { %v977_v36 = vadd.f32 %v976_v13, %v907_v25  ;;  %v998_v31 = vsub.s32 %v995_v6, %v997_v33 }
 0x13e   :  { %v941_v53 = vadd.f32 %v940_v14, %v908_v19 }
 0x13f   :  { %v978_v62 = vadd.f32 %v977_v36, %v909_v32 }
 0x140   :  { %v942_v51 = vadd.f32 %v941_v53, %v910_v11 }
 0x141   :  { %v979_v48 = vadd.f32 %v978_v62, %v911_v42 }
 0x142   :  { %v943_v28 = vrot.slane %v942_v51, 4 }
 0x143   :  { %v980_v3 = vrot.slane %v979_v48, 4 }
 0x144   :  { %v944_v18 = vadd.f32 %v943_v28, %v942_v51 }
 0x145   :  { %v981_v47 = vadd.f32 %v980_v3, %v979_v48 }
 0x146   :  { %v945_v55 = vrot.slane %v944_v18, 2 }
 0x147   :  { %v982_v41 = vrot.slane %v981_v47, 2 }
 0x148   :  { %v946_v37 = vadd.f32 %v945_v55, %v944_v18 }
 0x149   :  { %v983_v0 = vadd.f32 %v982_v41, %v981_v47 }
 0x14a   :  { %v947_v20 = vrot.slane %v946_v37, 1 }
 0x14b   :  { %v984_v34 = vrot.slane %v983_v0, 1 }
 0x14c   :  { %v948_v10 = vadd.f32 %v947_v20, %v946_v37 }
 0x14d   :  { %v985_v16 = vadd.f32 %v984_v34, %v983_v0 }
 0x14e   :  { %v988_v44 = vadd.f32 %v987_v35, %v948_v10 }
 0x14f   :  { %v989_v5 = vadd.f32 %v987_v35, %v985_v16 }
 0x151   :  { %v992_v15 = vcombine.low %v988_v44, %v989_v5 }
 0x153   :  { %v999_v40 = vrot.slane %v992_v15, %v998_v31 }
 0x155   :  { %v1006_v52 = vrot.slane %v999_v40, %v998_v31 }
 0x157   :  { %1012 = vst.msk [vmem:[%s1704_s5] sm:$0x3] %vm1010_vm1, %v1006_v52 }

</bundles_post_ra>
